<compile_context>
chip_gen: v6e
topology: v6e:2x2x1
jax: 0.10.0
libtpu: 0.0.40
codegen_flags: <defaults>
</compile_context>

<pallas_src>
import functools

import jax
import jax.numpy as jnp
from jax.experimental import pallas as pl
from jax.experimental.pallas import tpu as pltpu


def _round_up(v, m):
    return ((v + m - 1) // m) * m


def _num_tensorcores():
    """Best-effort TensorCores-per-device: v5e/v6e expose 1, v7x exposes 2."""
    try:
        kind = str(jax.devices()[0].device_kind).lower()
    except Exception:
        return 1
    return 2 if "7" in kind else 1


def _per_row_vmem_bytes(c, in_itemsize):
    """Conservative VMEM bytes per logits row while one tile is in flight."""
    c_lanes = _round_up(c, 128)
    return (2 * c_lanes * in_itemsize    # logits tile, double-buffered, native dtype
            + 6 * c_lanes * 4            # f32/i32 temporaries: x_f32, z, exp(z), iota, w, lp*w
            + 6 * 128 * 4)               # (tm,1) targets (x2 bufs) / acc / max / lse, lane-padded


def _choose_tm(n, c, in_itemsize, row_align):
    per_row = _per_row_vmem_bytes(c, in_itemsize)
    budget = 36 * 1024 * 1024            # leaves headroom inside v7x's 64 MiB VMEM
    tm = min(8192, budget // per_row, _round_up(n, row_align))
    return max(row_align, (tm // row_align) * row_align)
    # TODO(synk): for very large class counts (C >= ~100K) add a class-axis grid
    # dimension with online (flash-style) LSE accumulation instead of shrinking tm.


def _ls_ce_kernel(x_ref, tgt_ref, wsm_ref, wcf_ref, out_ref, acc_ref,
                  *, n_valid, tm, inner_tiles, num_tiles, has_clamped):
    p = pl.program_id(0)          # superblock axis (core-parallel on v7x)
    q = pl.program_id(1)          # reduction axis within a superblock

    @pl.when(q == 0)
    def _():
        acc_ref[...] = jnp.zeros_like(acc_ref)

    tile = p * inner_tiles + q

    def compute():
        # Cast to f32 in-kernel (input may stream in as bf16).
        x = x_ref[...].astype(jnp.float32)                     # (tm, C)

        # log-softmax over the class axis.
        m = jnp.max(x, axis=-1, keepdims=True)
        z = x - m
        lse = jnp.log(jnp.sum(jnp.exp(z), axis=-1, keepdims=True))
        lp = z - lse                                           # (tm, C)

        # Fused per-class weights: smoothing term + one-hot confidence term.
        tgt = tgt_ref[...]                                     # (tm, 1) int32
        col = jax.lax.broadcasted_iota(jnp.int32, lp.shape, 1)
        w = wsm_ref[...] + jnp.where(col == tgt, wcf_ref[...], 0.0)

        loss = -jnp.sum(lp * w, axis=-1, keepdims=True)        # (tm, 1)

        # Rows past the true row count (ragged last tile) contribute zero.
        # The block read past the array end may hold garbage, but it stays
        # confined per-row and the where() drops any Inf/NaN it produced.
        row = jax.lax.broadcasted_iota(jnp.int32, loss.shape, 0) + tile * tm
        acc_ref[...] += jnp.where(row < n_valid, loss, 0.0)

    if has_clamped:
        # Clamped (wasted) tiles of the 2-level grid skip the compute entirely.
        pl.when(tile < num_tiles)(compute)
    else:
        compute()

    @pl.when(q == pl.num_programs(1) - 1)
    def _():
        # One cross-sublane reduce per superblock; partial sum goes to HBM.
        out_ref[...] = jnp.sum(acc_ref[...], axis=0, keepdims=True).reshape(1, 1, 1)


def _xla_label_smoothing_ce(x, target, alpha, smoothing):
    """Plain-XLA implementation (tiny-C fallback; also the test reference)."""
    confidence = 1.0 - smoothing
    c = x.shape[-1]
    lp = jax.nn.log_softmax(x.astype(jnp.float32), axis=-1).reshape(-1, c)
    lp = lp * jnp.asarray(alpha, jnp.float32).reshape(1, c)
    tgt = target.reshape(-1).astype(jnp.int32)
    nll = -jnp.take_along_axis(lp, tgt[:, None], axis=-1)[:, 0]
    smooth = -jnp.mean(lp, axis=-1)
    return jnp.mean(confidence * nll + smoothing * smooth)


def label_smoothing_cross_entropy(x, target, alpha, smoothing=0.1, *,
                                  tm=None, num_superblocks=None,
                                  xla_below_classes=0):
    """x: (..., C) logits, target: (...) int class indices, alpha: (C,) float."""
    confidence = 1.0 - smoothing
    c = x.shape[-1]
    alpha = jnp.asarray(alpha, dtype=jnp.float32).reshape(-1)
    assert alpha.shape == (c,)

    # For C << 128 every vreg / VPU / EUP op uses only C/128 lanes; production
    # callers can route that regime to plain XLA (perf-review item).  Default 0
    # keeps the Pallas kernel as the exercised deliverable for any C.
    if c < xla_below_classes:
        return _xla_label_smoothing_ce(x, target, alpha, smoothing)
    # TODO(synk): alternatively pack G=128//C rows along the lane axis with
    # segmented lane reductions to keep tiny-C fully inside Pallas.

    x2 = x.reshape(-1, c)                           # native dtype, no copy/pad
    tgt = target.reshape(-1, 1).astype(jnp.int32)   # (N, 1)
    n = x2.shape[0]

    itemsize = jnp.dtype(x2.dtype).itemsize
    row_align = max(8, 32 // max(1, itemsize))      # 8 (f32) / 16 (bf16) / 32 (int8)
    if tm is None:
        tm = _choose_tm(n, c, itemsize, row_align)
    tm = max(row_align, (tm // row_align) * row_align)

    num_tiles = pl.cdiv(n, tm)
    if num_superblocks is None:
        num_superblocks = _num_tensorcores()        # 1 on v5e/v6e, 2 on v7x
    p_blocks = max(1, min(num_superblocks, num_tiles))
    q_tiles = pl.cdiv(num_tiles, p_blocks)
    has_clamped = p_blocks * q_tiles > num_tiles

    # Precomputed resident per-class weight vectors (1, C).
    w_smooth = (alpha * (smoothing / c)).reshape(1, c)
    w_conf = (alpha * confidence).reshape(1, c)

    def tile_idx(p, q):
        # Clamp so wasted (p, q) pairs never index past the array; their
        # compute is skipped in-kernel via pl.when.
        return jnp.minimum(p * q_tiles + q, num_tiles - 1)

    # VMEM budget: double-buffered native-dtype logits tile + in-kernel f32
    # temporaries + lane-padded (tm,1) blocks + resident weights + slack.
    c_lanes = _round_up(c, 128)
    est = (tm * _per_row_vmem_bytes(c, itemsize)
           + 4 * 8 * c_lanes * 4                    # two (1,C) weights, dbl-buffered, sublane-padded
           + (1 << 20))
    vmem_limit = int(min(60 * 1024 * 1024,
                         max(32 * 1024 * 1024, est + 12 * 1024 * 1024)))

    kernel = functools.partial(_ls_ce_kernel, n_valid=n, tm=tm,
                               inner_tiles=q_tiles, num_tiles=num_tiles,
                               has_clamped=has_clamped)

    def run(dim_sem):
        return pl.pallas_call(
            kernel,
            out_shape=jax.ShapeDtypeStruct((p_blocks, 1, 1), jnp.float32),
            grid_spec=pltpu.PrefetchScalarGridSpec(
                num_scalar_prefetch=0,
                grid=(p_blocks, q_tiles),
                in_specs=[
                    pl.BlockSpec((tm, c), lambda p, q: (tile_idx(p, q), 0)),  # logits
                    pl.BlockSpec((tm, 1), lambda p, q: (tile_idx(p, q), 0)),  # targets
                    pl.BlockSpec((1, c), lambda p, q: (0, 0)),                # smooth w (resident)
                    pl.BlockSpec((1, c), lambda p, q: (0, 0)),                # conf w  (resident)
                ],
                out_specs=pl.BlockSpec((1, 1, 1), lambda p, q: (p, 0, 0)),
                scratch_shapes=[pltpu.VMEM((tm, 1), jnp.float32)],
            ),
            compiler_params=pltpu.CompilerParams(
                dimension_semantics=dim_sem,
                vmem_limit_bytes=vmem_limit),
        )(x2, tgt, w_smooth, w_conf)

    if p_blocks > 1 and _num_tensorcores() > 1:
        # v7x: only CORE_PARALLEL actually shards the outer axis across the
        # two TensorCores; fall back to plain "parallel" if unsupported.
        try:
            partials = run((getattr(pltpu, "CORE_PARALLEL", pltpu.PARALLEL),
                            pltpu.ARBITRARY))
        except Exception:
            partials = run(("parallel", "arbitrary"))
    else:
        partials = run(("parallel", "arbitrary"))

    return jnp.sum(partials) / jnp.float32(n)


if __name__ == "__main__":
    key = jax.random.PRNGKey(0)
    kx, kt = jax.random.split(key)

    # Module spec: alpha=[0.5, 0.5] implies 2 classes.
    B, S, C = 2, 16, 2
    alpha = jnp.array([0.5, 0.5], dtype=jnp.float32)
    smoothing = 0.1

    x = jax.random.normal(kx, (B, S, C), dtype=jnp.float32)
    target = jax.random.randint(kt, (B, S), 0, C)

    loss = jax.block_until_ready(
        label_smoothing_cross_entropy(x, target, alpha, smoothing))
    ref = _xla_label_smoothing_ce(x, target, alpha, smoothing)
    assert jnp.allclose(loss, ref, atol=1e-5, rtol=1e-5), (loss, ref)

    # The tiny-C XLA dispatch path (perf-review item) also runs and matches.
    loss_xla = jax.block_until_ready(
        label_smoothing_cross_entropy(x, target, alpha, smoothing,
                                      xla_below_classes=128))
    assert jnp.allclose(loss_xla, ref, atol=1e-5, rtol=1e-5), (loss_xla, ref)

    # Pallas-path stress cases: one big tile, ragged N with native-bf16
    # streaming, larger multi-lane-tile C, and an explicit 2-superblock split
    # with a clamped + ragged tile (exercises the pl.when guard).
    cases = [
        dict(n=2048, c=2, dtype=jnp.float32),
        dict(n=1300, c=5, dtype=jnp.bfloat16),
        dict(n=4096, c=384, dtype=jnp.float32),
        dict(n=700, c=3, dtype=jnp.float32, tm=256, num_superblocks=2),
    ]
    k = kx
    for case in cases:
        k, ka, kx2, kt2 = jax.random.split(k, 4)
        n_rows, c2, dt = case["n"], case["c"], case["dtype"]
        a2 = jax.random.uniform(ka, (c2,), dtype=jnp.float32) + 0.5
        x2 = jax.random.normal(kx2, (n_rows, c2), dtype=dt)
        t2 = jax.random.randint(kt2, (n_rows,), 0, c2)
        out = jax.block_until_ready(label_smoothing_cross_entropy(
            x2, t2, a2, smoothing,
            tm=case.get("tm"), num_superblocks=case.get("num_superblocks")))
        ref2 = _xla_label_smoothing_ce(x2, t2, a2, smoothing)
        assert jnp.allclose(out, ref2, atol=2e-4, rtol=2e-4), (case, out, ref2)

    print("KERNEL_OK")
</pallas_src>

<mosaic_0001>
module attributes {stable_mosaic.version = 11 : i64} {
  func.func @_ls_ce_kernel(%arg0: i32, %arg1: i32, %arg2: memref<32x2xf32, #tpu.memory_space<vmem>>, %arg3: memref<32x1xi32, #tpu.memory_space<vmem>>, %arg4: memref<1x2xf32, #tpu.memory_space<vmem>>, %arg5: memref<1x2xf32, #tpu.memory_space<vmem>>, %arg6: memref<1x1x1xf32, #tpu.memory_space<vmem>>, %arg7: memref<32x1xf32, #tpu.memory_space<vmem>>) attributes {dimension_semantics = [#tpu.dimension_semantics<parallel>, #tpu.dimension_semantics<arbitrary>], iteration_bounds = array<i64: 1, 1>, scalar_prefetch = 0 : i64, scratch_operands = 1 : i64, tpu.core_type = #tpu.core_type<tc>, window_params = [{transform_indices = @transform_0, window_bounds = array<i64: 32, 2>}, {transform_indices = @transform_1, window_bounds = array<i64: 32, 1>}, {pipeline_mode = #tpu.pipeline_mode<synchronous>, transform_indices = @transform_2, window_bounds = array<i64: 1, 2>}, {pipeline_mode = #tpu.pipeline_mode<synchronous>, transform_indices = @transform_3, window_bounds = array<i64: 1, 2>}, {transform_indices = @transform_4, window_bounds = array<i64: 1, 1, 1>}]} {
    %c0_i32 = arith.constant 0 : i32
    %0 = arith.cmpi eq, %arg1, %c0_i32 : i32
    %1 = arith.extui %0 : i1 to i32
    %c0_i32_0 = arith.constant 0 : i32
    %2 = arith.cmpi ne, %1, %c0_i32_0 : i32
    scf.if %2 {
      %cst_20 = arith.constant 0.000000e+00 : f32
      %47 = vector.broadcast %cst_20 : f32 to vector<32x1xf32>
      %c0_21 = arith.constant 0 : index
      %c0_22 = arith.constant 0 : index
      %48 = vector.load %arg7[%c0_21, %c0_22] : memref<32x1xf32, #tpu.memory_space<vmem>>, vector<32x1xf32>
      tpu.vector_store %arg7[%c0_21, %c0_22], %47 {strides = array<i32>} : memref<32x1xf32, #tpu.memory_space<vmem>>, vector<32x1xf32>,
    } else {
    }
    %c1_i32 = arith.constant 1 : i32
    %3 = arith.muli %arg0, %c1_i32 : i32
    %4 = arith.addi %3, %arg1 : i32
    %c0 = arith.constant 0 : index
    %c0_1 = arith.constant 0 : index
    %5 = vector.load %arg2[%c0, %c0_1] : memref<32x2xf32, #tpu.memory_space<vmem>>, vector<32x2xf32>
    %cst = arith.constant dense<0xFF800000> : vector<32xf32>
    %6 = vector.multi_reduction <maximumf>, %5, %cst [1] : vector<32x2xf32> to vector<32xf32>
    %7 = vector.shape_cast %6 : vector<32xf32> to vector<32x1xf32>
    %8 = vector.broadcast %7 : vector<32x1xf32> to vector<32x2xf32>
    %9 = arith.subf %5, %8 : vector<32x2xf32>
    %10 = math.exp %9 : vector<32x2xf32>
    %cst_2 = arith.constant dense<0.000000e+00> : vector<32xf32>
    %11 = vector.multi_reduction <add>, %10, %cst_2 [1] : vector<32x2xf32> to vector<32xf32>
    %12 = vector.shape_cast %11 : vector<32xf32> to vector<32x1xf32>
    %13 = math.log %12 : vector<32x1xf32>
    %14 = vector.broadcast %13 : vector<32x1xf32> to vector<32x2xf32>
    %15 = arith.subf %9, %14 : vector<32x2xf32>
    %c0_3 = arith.constant 0 : index
    %c0_4 = arith.constant 0 : index
    %16 = vector.load %arg3[%c0_3, %c0_4] : memref<32x1xi32, #tpu.memory_space<vmem>>, vector<32x1xi32>
    %17 = tpu.iota {dimensions = array<i32: 1>} : vector<32x2xi32>
    %c0_5 = arith.constant 0 : index
    %c0_6 = arith.constant 0 : index
    %18 = vector.load %arg4[%c0_5, %c0_6] : memref<1x2xf32, #tpu.memory_space<vmem>>, vector<1x2xf32>
    %19 = vector.broadcast %16 : vector<32x1xi32> to vector<32x2xi32>
    %20 = arith.cmpi eq, %17, %19 : vector<32x2xi32>
    %c0_7 = arith.constant 0 : index
    %c0_8 = arith.constant 0 : index
    %21 = vector.load %arg5[%c0_7, %c0_8] : memref<1x2xf32, #tpu.memory_space<vmem>>, vector<1x2xf32>
    %cst_9 = arith.constant 0.000000e+00 : f32
    %22 = vector.shape_cast %21 : vector<1x2xf32> to vector<1x2xf32>
    %23 = vector.broadcast %22 : vector<1x2xf32> to vector<32x2xf32>
    %24 = vector.broadcast %cst_9 : f32 to vector<32x2xf32>
    %25 = arith.select %20, %23, %24 : vector<32x2xi1>, vector<32x2xf32>
    %26 = vector.broadcast %18 : vector<1x2xf32> to vector<32x2xf32>
    %27 = arith.addf %26, %25 : vector<32x2xf32>
    %28 = arith.mulf %15, %27 : vector<32x2xf32>
    %cst_10 = arith.constant dense<0.000000e+00> : vector<32xf32>
    %29 = vector.multi_reduction <add>, %28, %cst_10 [1] : vector<32x2xf32> to vector<32xf32>
    %30 = vector.shape_cast %29 : vector<32xf32> to vector<32x1xf32>
    %cst_11 = arith.constant 0.000000e+00 : f32
    %31 = vector.broadcast %cst_11 : f32 to vector<32x1xf32>
    %32 = arith.subf %31, %30 : vector<32x1xf32>
    %33 = tpu.iota {dimensions = array<i32: 0>} : vector<32x1xi32>
    %c32_i32 = arith.constant 32 : i32
    %34 = arith.muli %4, %c32_i32 : i32
    %35 = vector.broadcast %34 : i32 to vector<32x1xi32>
    %36 = arith.addi %33, %35 : vector<32x1xi32>
    %c0_12 = arith.constant 0 : index
    %c0_13 = arith.constant 0 : index
    %37 = vector.load %arg7[%c0_12, %c0_13] : memref<32x1xf32, #tpu.memory_space<vmem>>, vector<32x1xf32>
    %c32_i32_14 = arith.constant 32 : i32
    %38 = vector.broadcast %c32_i32_14 : i32 to vector<32x1xi32>
    %39 = arith.cmpi slt, %36, %38 : vector<32x1xi32>
    %cst_15 = arith.constant 0.000000e+00 : f32
    %40 = vector.broadcast %cst_15 : f32 to vector<32x1xf32>
    %41 = arith.select %39, %32, %40 : vector<32x1xi1>, vector<32x1xf32>
    %42 = arith.addf %37, %41 : vector<32x1xf32>
    %c0_16 = arith.constant 0 : index
    %c0_17 = arith.constant 0 : index
    %43 = vector.load %arg7[%c0_16, %c0_17] : memref<32x1xf32, #tpu.memory_space<vmem>>, vector<32x1xf32>
    tpu.vector_store %arg7[%c0_16, %c0_17], %42 {strides = array<i32>} : memref<32x1xf32, #tpu.memory_space<vmem>>, vector<32x1xf32>,
    %c0_i32_18 = arith.constant 0 : i32
    %44 = arith.cmpi eq, %arg1, %c0_i32_18 : i32
    %45 = arith.extui %44 : i1 to i32
    %c0_i32_19 = arith.constant 0 : i32
    %46 = arith.cmpi ne, %45, %c0_i32_19 : i32
    scf.if %46 {
      %c0_20 = arith.constant 0 : index
      %c0_21 = arith.constant 0 : index
      %47 = vector.load %arg7[%c0_20, %c0_21] : memref<32x1xf32, #tpu.memory_space<vmem>>, vector<32x1xf32>
      %cst_22 = arith.constant dense<0.000000e+00> : vector<1xf32>
      %48 = vector.multi_reduction <add>, %47, %cst_22 [0] : vector<32x1xf32> to vector<1xf32>
      %49 = vector.shape_cast %48 : vector<1xf32> to vector<1x1xf32>
      %50 = vector.shape_cast %49 : vector<1x1xf32> to vector<1x1x1xf32>
      %c0_23 = arith.constant 0 : index
      %c0_24 = arith.constant 0 : index
      %c0_25 = arith.constant 0 : index
      %51 = vector.load %arg6[%c0_23, %c0_24, %c0_25] : memref<1x1x1xf32, #tpu.memory_space<vmem>>, vector<1x1x1xf32>
      tpu.vector_store %arg6[%c0_23, %c0_24, %c0_25], %50 {strides = array<i32>} : memref<1x1x1xf32, #tpu.memory_space<vmem>>, vector<1x1x1xf32>,
    } else {
    }
    return
  }
  func.func @transform_0(%arg0: i32, %arg1: i32) -> (i32, i32) {
    %c1_i32 = arith.constant 1 : i32
    %0 = arith.muli %arg0, %c1_i32 : i32
    %1 = arith.addi %0, %arg1 : i32
    %c0_i32 = arith.constant 0 : i32
    %2 = arith.minsi %1, %c0_i32 : i32
    %c0_i32_0 = arith.constant 0 : i32
    %c0_i32_1 = arith.constant 0 : i32
    return %2, %c0_i32_0 : i32, i32
  }
  func.func @transform_1(%arg0: i32, %arg1: i32) -> (i32, i32) {
    %c1_i32 = arith.constant 1 : i32
    %0 = arith.muli %arg0, %c1_i32 : i32
    %1 = arith.addi %0, %arg1 : i32
    %c0_i32 = arith.constant 0 : i32
    %2 = arith.minsi %1, %c0_i32 : i32
    %c0_i32_0 = arith.constant 0 : i32
    %c0_i32_1 = arith.constant 0 : i32
    return %2, %c0_i32_0 : i32, i32
  }
  func.func @transform_2(%arg0: i32, %arg1: i32) -> (i32, i32) {
    %c0_i32 = arith.constant 0 : i32
    %c0_i32_0 = arith.constant 0 : i32
    %c0_i32_1 = arith.constant 0 : i32
    return %c0_i32, %c0_i32_0 : i32, i32
  }
  func.func @transform_3(%arg0: i32, %arg1: i32) -> (i32, i32) {
    %c0_i32 = arith.constant 0 : i32
    %c0_i32_0 = arith.constant 0 : i32
    %c0_i32_1 = arith.constant 0 : i32
    return %c0_i32, %c0_i32_0 : i32, i32
  }
  func.func @transform_4(%arg0: i32, %arg1: i32) -> (i32, i32, i32) {
    %c0_i32 = arith.constant 0 : i32
    %c0_i32_0 = arith.constant 0 : i32
    %c0_i32_1 = arith.constant 0 : i32
    return %arg0, %c0_i32, %c0_i32_0 : i32, i32, i32
  }
}

</mosaic_0001>

<bundles_post_ra>
// kernel: tpu_custom_call.1
= control target key start
LH: loop header
LB: loop body
LE: loop exit
PB: predicated region body
PF: predicated region fallthrough
CT: control target
= control target key end

     0   :  { %vm96_vm0 = vcmask 15360   ;;  %s431_s0 = inlined_call_operand.vmem [shape: f32[32,2], index: 0, kind: input, shape index: {}]   ;;  %s432_s1 = inlined_call_operand.vmem [shape: s32[32,1], index: 1, kind: input, shape index: {}]   ;;  %s433_s2 = inlined_call_operand.vmem [shape: f32[1,2], index: 2, kind: input, shape index: {}]   ;;  %s434_s3 = inlined_call_operand.vmem [shape: f32[1,2], index: 3, kind: input, shape index: {}]   ;;  %s435_s4 = inlined_call_operand.hbm [shape: f32[1,1,1], index: 4, kind: output, shape index: {}]  }
   0x1   :  { %v92_v0 = vld [vmem:[%s431_s0] sm:$0xff]  ;;  %v94_v1 = vld [vmem:[%s431_s0 + $0x10] sm:$0xff]  ;;  %v93_v2 = vld [vmem:[%s431_s0 + $0x8] sm:$0xff] }
   0x2   :  { %v97_v3 = vsel %vm96_vm0, %v92_v0, -inf  ;;  %v103_v4 = vsel %vm96_vm0, %v94_v1, -inf  ;;  %v95_v5 = vld [vmem:[%s431_s0 + $0x18] sm:$0xff] }
   0x3   :  { %9 = vsyncpa [#allocation4], 0  ;;  %98 = vmax.xlane.f32.xlu0 %v97_v3  ;;  %104 = vmax.xlane.f32.xlu1 %v103_v4  ;;  %v100_v6 = vsel %vm96_vm0, %v93_v2, -inf  ;;  %v106_v7 = vsel %vm96_vm0, %v95_v5, -inf  ;;  %v334_v8 = vmov 0   ;;  %v146_v24 = vld [vmem:[%s432_s1 + $0x8] sm:$0xff]  ;;  %v149_v36 = vlaneseq }
   0x4   :  { %295 = vset.pattern.permute.xlu1 %v334_v8  ;;  %294 = vset.pattern.permute.xlu0 %v334_v8  ;;  %v147_v25 = vld [vmem:[%s432_s1 + $0x10] sm:$0xff]  ;;  %v145_v26 = vld [vmem:[%s432_s1] sm:$0xff]  ;;  %v148_v32 = vld [vmem:[%s432_s1 + $0x18] sm:$0xff]  ;;  %vm86_vm4 = vcmask 7168   ;;  %vm261_vm6 = vcmask 0  }
   0x5   :  { %v150_v38 = vand.u32 127, %v149_v36  ;;  %v289_v40 = vld [vmem:[%s434_s3] ss:$0 sm:$0xff] }
   0x6   :  { %v290_v43 = vld [vmem:[%s433_s2] ss:$0 sm:$0xff]  ;;  %s336_s2 = smov [#allocation3]  }
   0x7   :  { %101 = vmax.xlane.f32.xlu0 %v100_v6  ;;  %107 = vmax.xlane.f32.xlu1 %v106_v7  ;;  %s269_s3 = sshll.u32 %s336_s2, 4  ;;  %s270_s3 = int_to_ptr.vmem [resolvable:$true] %s269_s3 }
   0x8   :  { %s312_s7 = scalar_lea.vmem %s270_s3, 16  ;;  %s316_s8 = scalar_lea.vmem %s270_s3, 32 }
   0x9   :  { %p313_p0 = scmp.ne.s32.totalorder %s270_s3, %s312_s7  ;;  %p317_p1 = scmp.lt.s32.totalorder %s270_s3, %s270_s3 }
   0xa   :  { %p318_p2 = scmp.lt.s32.totalorder %s316_s8, %s312_s7 }
   0xc   :  { %p319_p3 = por %p318_p2, %p317_p1 }
   0xe   :  { %p320_p4 = pnand %p319_p3, %p313_p0 }
  0x8c   :  { %v99_v9 = vpop.xlane.xlu0 %98  ;;  %v105_v10 = vpop.xlane.xlu1 %104 }
  0x8d   :  { %v109_v11 = vsub.f32 %v92_v0, %v99_v9  ;;  %v378_v12 = vsub.f32 %v94_v1, %v105_v10  ;;  %v335_v0 = vmov 0.0  }
  0x8e   :  { %87 = vst.msk [vmem:[#allocation2] sm:$0xff] %vm86_vm4, %v335_v0  ;;  %88 = vst.msk [vmem:[#allocation2 + $0x8] sm:$0xff] %vm86_vm4, %v335_v0 }
  0x8f   :  { %v113_v13 = vmul.f32 1.442695, %v109_v11  ;;  %v117_v14 = vmul.f32 1.442695, %v378_v12  ;;  %89 = vst.msk [vmem:[#allocation2 + $0x10] sm:$0xff] %vm86_vm4, %v335_v0  ;;  %90 = vst.msk [vmem:[#allocation2 + $0x18] sm:$0xff] %vm86_vm4, %v335_v0 }
  0x90   :  { %v102_v15 = vpop.xlane.xlu0 %101  ;;  %v108_v27 = vpop.xlane.xlu1 %107 }
  0x91   :  { %296 = vpow2.f32 %v113_v13  ;;  %v381_v16 = vsub.f32 %v93_v2, %v102_v15  ;;  %v396_v28 = vsub.f32 %v95_v5, %v108_v27 }
  0x92   :  { %298 = vpow2.f32 %v117_v14 }
  0x93   :  { %v115_v17 = vmul.f32 1.442695, %v381_v16  ;;  %v119_v29 = vmul.f32 1.442695, %v396_v28 }
  0x95   :  { %300 = vpow2.f32 %v115_v17  ;;  %v221_v15 = vld [vmem:[#allocation2 + $0x8] sm:$0xff] }
  0x96   :  { %302 = vpow2.f32 %v119_v29  ;;  %v222_v17 = vld [vmem:[#allocation2 + $0x10] sm:$0xff] }
  0x9e   :  { %v297_v18 = vpop.eup %296 }
  0x9f   :  { %v299_v19 = vpop.eup %298  ;;  %v121_v20 = vsel %vm96_vm0, %v297_v18, 0.0 }
  0xa0   :  { %122 = vadd.xlane.f32.xlu0 %v121_v20  ;;  %v127_v21 = vsel %vm96_vm0, %v299_v19, 0.0 }
  0xa2   :  { %v301_v22 = vpop.eup %300 }
  0xa3   :  { %v124_v23 = vsel %vm96_vm0, %v301_v22, 0.0  ;;  %v303_v30 = vpop.eup %302 }
  0xa4   :  { %128 = vadd.xlane.f32.xlu0 %v127_v21  ;;  %125 = vadd.xlane.f32.xlu1 %v124_v23  ;;  %v130_v31 = vsel %vm96_vm0, %v303_v30, 0.0  ;;  %v223_v23 = vld [vmem:[#allocation2 + $0x18] sm:$0xff] }
  0xb5   :  { %156 = vperm.xlu1 %295, %v146_v24  }
  0xb9   :  { %159 = vperm.xlu1 %295, %v147_v25  }
  0xba   :  { %153 = vperm.xlu0 %294, %v145_v26  }
  0xdd   :  { %131 = vadd.xlane.f32.xlu1 %v130_v31 }
  0xee   :  { %162 = vperm.xlu1 %295, %v148_v32  }
 0x129   :  { %v123_v33 = vpop.xlane.xlu0 %122 }
 0x12a   :  { %304 = vlog2.f32 %v123_v33 }
 0x12d   :  { %v126_v34 = vpop.xlane.xlu1 %125  ;;  %v129_v35 = vpop.xlane.xlu0 %128 }
 0x12e   :  { %306 = vlog2.f32 %v126_v34 }
 0x12f   :  { %308 = vlog2.f32 %v129_v35 }
 0x131   :  { %v157_v37 = vpop.permute.xlu1 %156 }
 0x132   :  { %vm165_vm2 = vcmp.eq.s32.totalorder %v150_v38, %v157_v37 }
 0x133   :  { %v176_v49 = vsel %vm165_vm2, %v289_v40, 0.0 }
 0x134   :  { %v186_v55 = vadd.f32 %v290_v43, %v176_v49 }
 0x135   :  { %v154_v39 = vpop.permute.xlu0 %153  ;;  %v160_v41 = vpop.permute.xlu1 %159 }
 0x136   :  { %vm164_vm1 = vcmp.eq.s32.totalorder %v150_v38, %v154_v39  ;;  %vm166_vm3 = vcmp.eq.s32.totalorder %v150_v38, %v160_v41 }
 0x137   :  { %v305_v42 = vpop.eup %304  ;;  %v175_v44 = vsel %vm164_vm1, %v289_v40, 0.0  ;;  %v177_v52 = vsel %vm166_vm3, %v289_v40, 0.0 }
 0x138   :  { %v134_v45 = vmul.f32 0.6931472, %v305_v42  ;;  %v185_v46 = vadd.f32 %v290_v43, %v175_v44  ;;  %v187_v58 = vadd.f32 %v290_v43, %v177_v52 }
 0x13a   :  { %v141_v47 = vsub.f32 %v109_v11, %v134_v45  ;;  %v220_v11 = vld [vmem:[#allocation2] sm:$0xff] }
 0x13b   :  { %v307_v48 = vpop.eup %306 }
 0x13c   :  { %v309_v50 = vpop.eup %308  ;;  %v136_v51 = vmul.f32 0.6931472, %v307_v48  ;;  %v189_v53 = vmul.f32 %v185_v46, %v141_v47 }
 0x13d   :  { %v138_v54 = vmul.f32 0.6931472, %v309_v50 }
 0x13e   :  { %v193_v56 = vsel %vm96_vm0, %v189_v53, 0.0  ;;  %v142_v57 = vsub.f32 %v381_v16, %v136_v51 }
 0x13f   :  { %194 = vadd.xlane.f32.xlu1 %v193_v56  ;;  %v143_v59 = vsub.f32 %v378_v12, %v138_v54 }
 0x140   :  { %v190_v60 = vmul.f32 %v186_v55, %v142_v57 }
 0x141   :  { %v191_v61 = vmul.f32 %v187_v58, %v143_v59 }
 0x142   :  { %v196_v62 = vsel %vm96_vm0, %v190_v60, 0.0 }
 0x143   :  { %197 = vadd.xlane.f32.xlu0 %v196_v62  ;;  %v199_v63 = vsel %vm96_vm0, %v191_v61, 0.0 }
 0x144   :  { %200 = vadd.xlane.f32.xlu1 %v199_v63 }
 0x166   :  { %v132_v1 = vpop.xlane.xlu1 %131 }
 0x167   :  { %310 = vlog2.f32 %v132_v1 }
 0x16a   :  { %v163_v2 = vpop.permute.xlu1 %162 }
 0x16b   :  { %vm167_vm5 = vcmp.eq.s32.totalorder %v150_v38, %v163_v2 }
 0x16c   :  { %v178_v4 = vsel %vm167_vm5, %v289_v40, 0.0 }
 0x16d   :  { %v188_v6 = vadd.f32 %v290_v43, %v178_v4 }
 0x174   :  { %v311_v3 = vpop.eup %310 }
 0x175   :  { %v140_v5 = vmul.f32 0.6931472, %v311_v3 }
 0x177   :  { %v144_v7 = vsub.f32 %v396_v28, %v140_v5 }
 0x179   :  { %v192_v8 = vmul.f32 %v188_v6, %v144_v7 }
 0x17b   :  { %v202_v9 = vsel %vm96_vm0, %v192_v8, 0.0 }
 0x17c   :  { %203 = vadd.xlane.f32.xlu1 %v202_v9 }
 0x1c8   :  { %v195_v10 = vpop.xlane.xlu1 %194 }
 0x1c9   :  { %v205_v12 = vsub.f32 0.0, %v195_v10 }
 0x1cb   :  { %v232_v13 = vadd.f32 %v220_v11, %v205_v12 }
 0x1cc   :  { %v198_v14 = vpop.xlane.xlu0 %197 }
 0x1cd   :  { %237 = vst.msk [vmem:[#allocation2] sm:$0xff] %vm86_vm4, %v232_v13  ;;  %v201_v16 = vpop.xlane.xlu1 %200  ;;  %v206_v18 = vsub.f32 0.0, %v198_v14 }
 0x1ce   :  { %v207_v19 = vsub.f32 0.0, %v201_v16 }
 0x1cf   :  { %v233_v20 = vadd.f32 %v221_v15, %v206_v18 }
 0x1d0   :  { %v234_v21 = vadd.f32 %v222_v17, %v207_v19 }
 0x1d1   :  { %238 = vst.msk [vmem:[#allocation2 + $0x8] sm:$0xff] %vm86_vm4, %v233_v20 }
 0x1d2   :  { %239 = vst.msk [vmem:[#allocation2 + $0x10] sm:$0xff] %vm86_vm4, %v234_v21 }
 0x1d4   :  { %v244_v27 = vld [vmem:[#allocation2] sm:$0xff] }
 0x1d5   :  { %v248_v29 = vsel %vm86_vm4, %v244_v27, 0.0 }
 0x1d8   :  { %v245_v25 = vld [vmem:[#allocation2 + $0x8] sm:$0xff] }
 0x1d9   :  { %v249_v28 = vsel %vm86_vm4, %v245_v25, 0.0  ;;  %v246_v30 = vld [vmem:[#allocation2 + $0x10] sm:$0xff] }
 0x1da   :  { %v250_v31 = vadd.f32 %v249_v28, %v248_v29  ;;  %v251_v32 = vsel %vm86_vm4, %v246_v30, 0.0 }
 0x1dc   :  { %v252_v34 = vadd.f32 %v251_v32, %v250_v31 }
 0x205   :  { %v204_v22 = vpop.xlane.xlu1 %203 }
 0x206   :  { %v208_v24 = vsub.f32 0.0, %v204_v22 }
 0x208   :  { %v235_v26 = vadd.f32 %v223_v23, %v208_v24 }
 0x20a   :  { %240 = vst.msk [vmem:[#allocation2 + $0x18] sm:$0xff] %vm86_vm4, %v235_v26 }
 0x211   :  { %v247_v33 = vld [vmem:[#allocation2 + $0x18] sm:$0xff] }
 0x212   :  { %v253_v35 = vsel %vm86_vm4, %v247_v33, 0.0 }
 0x213   :  { %v254_v36 = vadd.f32 %v253_v35, %v252_v34 }
 0x215   :  { %v255_v37 = vrot.slane %v254_v36, 4 }
 0x217   :  { %v256_v38 = vadd.f32 %v255_v37, %v254_v36 }
 0x219   :  { %v257_v39 = vrot.slane %v256_v38, 2 }
 0x21b   :  { %v258_v40 = vadd.f32 %v257_v39, %v256_v38 }
 0x21d   :  { %v259_v41 = vrot.slane %v258_v40, 1 }
 0x21f   :  { %v260_v42 = vadd.f32 %v259_v41, %v258_v40 }
 0x221   :  { %262 = vst.msk [vmem:[#allocation3] sm:$0x1] %vm261_vm6, %v260_v42 }
 0x222   :  { %323 = shalt.err (!%p320_p4)
}
 0x223   :  { %272 = dma.vmem_to_hbm [thread:$0]  %s270_s3, 16, %s435_s4, [#allocation4]  }
 0x224   :  { %332 = dma.done.wait [#allocation4], 16  }
 0x225   :  { %333 = vsyncadd [#allocation4], 4294967280 }
 0x226   :  { %276 = vsyncpa [#allocation4], 1 }

</bundles_post_ra>
